<compile_context>
chip_gen: v7x
topology: tpu7x:2x2x1
jax: 0.10.0
libtpu: 0.0.40
codegen_flags: <defaults>
</compile_context>

<pallas_src>
import functools

import numpy as np
import jax
import jax.numpy as jnp
from jax.experimental import pallas as pl
from jax.experimental.pallas import tpu as pltpu


# ----------------------------------------------------------------------------
# Kernel: per-step RBF statistics + cross-batch accumulation (per core)
# ----------------------------------------------------------------------------
def _discrepancy_kernel(*refs, inv_two_sigma_sq, inv_d, sf, var_red, precision):
    if sf:
        (yp_ref, yt_ref, ll_ref,
         ppse_ref, ppb_ref, pt_ref, s1_ref, s2_ref, llv_ref,
         acc_ppb, acc_pt, acc_s1, acc_s2, acc_ll) = refs
    else:
        (yp_ref, yt_ref,
         ppse_ref, ppb_ref, pt_ref,
         acc_ppb, acc_pt) = refs

    b = pl.program_id(1)
    nb = pl.num_programs(1)
    n = acc_ppb.shape[0]

    @pl.when(b == 0)
    def _init():
        acc_ppb[...] = jnp.zeros_like(acc_ppb)
        acc_pt[...] = jnp.zeros_like(acc_pt)
        if sf:
            acc_s1[...] = jnp.zeros_like(acc_s1)
            acc_s2[...] = jnp.zeros_like(acc_s2)
            acc_ll[...] = jnp.zeros_like(acc_ll)

    yp = yp_ref[...]                 # (tb, n, Dp)  native dtype, straight to MXU
    yt = yt_ref[...]                 # (tb, 1, Dp)

    # pred/pred Gram (batched MXU, f32 accumulate) and pred/true "single-query"
    # matmul.  No HBM-side concatenation of y_true onto y_pred is needed.
    gram_pp = jnp.einsum('bid,bjd->bij', yp, yp,
                         preferred_element_type=jnp.float32,
                         precision=precision)                      # (tb, n, n)
    gram_pt = jnp.einsum('bod,bjd->boj', yt, yp,
                         preferred_element_type=jnp.float32,
                         precision=precision)                      # (tb, 1, n)

    row = jax.lax.broadcasted_iota(jnp.int32, (n, n), 0)
    col = jax.lax.broadcasted_iota(jnp.int32, (n, n), 1)
    eye = row == col

    # Squared norms of the prediction samples come off the Gram diagonal
    # (no separate norm pass).  The Gram is symmetric, so the "row" version is
    # just the transpose; the masked sublane reduce is kept because it lowers
    # trivially and is off the critical (MXU) path.
    gdiag = jnp.where(eye, gram_pp, 0.0)
    sq_p = jnp.sum(gdiag, axis=-1, keepdims=True)                  # (tb, n, 1)
    sq_p_row = jnp.sum(gdiag, axis=-2, keepdims=True)              # (tb, 1, n)

    ytf = yt.astype(jnp.float32)                                   # tiny row cast
    sq_t = jnp.sum(ytf * ytf, axis=-1, keepdims=True)              # (tb, 1, 1)

    dist_pp = jnp.maximum(sq_p + sq_p_row - 2.0 * gram_pp, 0.0)
    k_pp = jnp.where(eye, 0.0, jnp.exp(-dist_pp * inv_two_sigma_sq))  # diag = 0
    dist_pt = jnp.maximum(sq_p_row + sq_t - 2.0 * gram_pt, 0.0)
    k_pt = jnp.exp(-dist_pt * inv_two_sigma_sq)                    # (tb, 1, n)

    # --- cross-batch accumulators (live in VMEM scratch across the b axis) ---
    acc_ppb[...] = acc_ppb[...] + jnp.sum(k_pp, axis=0)            # (n, n)
    acc_pt[...] = acc_pt[...] + jnp.sum(k_pt)                      # (1, 1)

    if sf:
        ll = ll_ref[...].astype(jnp.float32)                       # (tb, 1, n)
        # sum_{i!=j}(ll_i+ll_j) K_ij == 2 * sum_j ll_j * colsum_j(K)  (symmetry)
        col_sum = jnp.sum(k_pp, axis=-2, keepdims=True)            # (tb, 1, n)
        acc_s1[...] = acc_s1[...] + 2.0 * jnp.sum(ll * col_sum)
        if var_red:
            pt_tot = jnp.sum(k_pt, axis=-1, keepdims=True)         # (tb, 1, 1)
            beta_pt = (pt_tot - k_pt) * (1.0 / float(n - 1))
            acc_s2[...] = acc_s2[...] + jnp.sum(ll * (k_pt - beta_pt))
            acc_ll[...] = acc_ll[...] + jnp.sum(ll, axis=0)        # (1, n)
        else:
            acc_s2[...] = acc_s2[...] + jnp.sum(ll * k_pt)

    # --- per-batch-element point_prediction_se metric ------------------------
    mean_pred = jnp.mean(yp, axis=1, keepdims=True, dtype=jnp.float32)  # (tb,1,Dp)
    diff = mean_pred - ytf
    ppse_ref[...] = jnp.sum(diff * diff, axis=-1, keepdims=True) * inv_d

    # --- flush per-core partial accumulators on the last batch step ----------
    @pl.when(b == nb - 1)
    def _flush():
        ppb_ref[...] = acc_ppb[...][None]
        pt_ref[...] = acc_pt[...][None]
        if sf:
            s1_ref[...] = acc_s1[...][None]
            s2_ref[...] = acc_s2[...][None]
            llv_ref[...] = acc_ll[...][None]


# ----------------------------------------------------------------------------
# tb / VMEM sizing
# ----------------------------------------------------------------------------
def _pick_tb_and_vmem(bs, n, dp, in_itemsize, sf, block_budget_bytes):
    bytes_per_b = (n + 1) * dp * in_itemsize + (4 * n if sf else 0)
    cands = [t for t in range(8, bs + 1, 8) if bs % t == 0]
    if cands:
        tb = min(cands)
        for t in sorted(cands, reverse=True):
            if t * bytes_per_b <= block_budget_bytes:
                tb = t
                break
    else:
        # bs < 8 or not a multiple of 8: a single full-batch block (correct,
        # just unpipelined).  Padding bs instead would require masking padded
        # rows out of the kernel sums (exp(-0) = 1 would pollute them).
        tb = bs
    block_bytes = tb * bytes_per_b
    # double-buffered inputs + a few (tb, n, n) f32 intermediates + margin
    need = 2 * block_bytes + 6 * tb * n * n * 4 + 8 * 2 ** 20
    vmem_limit = int(min(64 * 2 ** 20, max(32 * 2 ** 20, need)))
    return tb, vmem_limit


# ----------------------------------------------------------------------------
# pallas_call wrapper: returns tiny per-core partial statistics + ppse metric
# ----------------------------------------------------------------------------
def fused_discrepancy_stats(yp, yt, ll_row, *, d_true, sigma_sq, sf, var_red,
                            block_budget_bytes=16 * 2 ** 20):
    bs, n, dp = yp.shape
    assert n >= 2, "DiscrepancyLoss requires n_adjs >= 2"
    in_itemsize = jnp.dtype(yp.dtype).itemsize

    tb, vmem_limit = _pick_tb_and_vmem(bs, n, dp, in_itemsize, sf,
                                       block_budget_bytes)
    nblocks = bs // tb
    # Leading "parallel" core axis: sharded across TCs on 2-TC chips (v7x),
    # a cheap 2-iteration outer loop on 1-TC chips (v5e/v6e).
    ncores = 2 if (nblocks >= 2 and nblocks % 2 == 0) else 1
    nb = nblocks // ncores

    precision = (jax.lax.Precision.HIGHEST
                 if jnp.dtype(yp.dtype) == jnp.float32 else None)

    kernel = functools.partial(
        _discrepancy_kernel,
        inv_two_sigma_sq=1.0 / (2.0 * float(sigma_sq)),
        inv_d=1.0 / float(d_true),
        sf=sf, var_red=var_red, precision=precision)

    in_specs = [
        pl.BlockSpec((tb, n, dp), lambda c, b: (c * nb + b, 0, 0)),
        pl.BlockSpec((tb, 1, dp), lambda c, b: (c * nb + b, 0, 0)),
    ]
    inputs = [yp, yt]
    if sf:
        in_specs.append(pl.BlockSpec((tb, 1, n), lambda c, b: (c * nb + b, 0, 0)))
        inputs.append(ll_row)

    out_shape = [
        jax.ShapeDtypeStruct((bs, 1, 1), jnp.float32),      # point_prediction_se
        jax.ShapeDtypeStruct((ncores, n, n), jnp.float32),  # partial sum_b K_pp
        jax.ShapeDtypeStruct((ncores, 1, 1), jnp.float32),  # partial sum K_pt
    ]
    out_specs = [
        pl.BlockSpec((tb, 1, 1), lambda c, b: (c * nb + b, 0, 0)),
        pl.BlockSpec((1, n, n), lambda c, b: (c, 0, 0)),
        pl.BlockSpec((1, 1, 1), lambda c, b: (c, 0, 0)),
    ]
    scratch = [
        pltpu.VMEM((n, n), jnp.float32),   # batch-summed pp kernel matrix
        pltpu.VMEM((1, 1), jnp.float32),   # pt kernel sum
    ]
    if sf:
        out_shape += [jax.ShapeDtypeStruct((ncores, 1, 1), jnp.float32),   # s1
                      jax.ShapeDtypeStruct((ncores, 1, 1), jnp.float32),   # s2
                      jax.ShapeDtypeStruct((ncores, 1, n), jnp.float32)]   # sum ll
        out_specs += [pl.BlockSpec((1, 1, 1), lambda c, b: (c, 0, 0)),
                      pl.BlockSpec((1, 1, 1), lambda c, b: (c, 0, 0)),
                      pl.BlockSpec((1, 1, n), lambda c, b: (c, 0, 0))]
        scratch += [pltpu.VMEM((1, 1), jnp.float32),   # sum ll*(row+col)sum(K_pp)
                    pltpu.VMEM((1, 1), jnp.float32),   # sum ll*(K_pt - beta_pt)
                    pltpu.VMEM((1, n), jnp.float32)]   # batch-summed ll

    cost = pl.CostEstimate(
        flops=int(2 * bs * n * (n + 1) * dp + 12 * bs * n * n),
        transcendentals=int(bs * n * (n + 1)),
        bytes_accessed=int(yp.size * in_itemsize + yt.size * in_itemsize
                           + (ll_row.size * 4 if sf else 0)
                           + 4 * (bs + 8 * n * n)))

    outs = pl.pallas_call(
        kernel,
        out_shape=tuple(out_shape),
        grid=(ncores, nb),
        in_specs=in_specs,
        out_specs=tuple(out_specs),
        scratch_shapes=scratch,
        compiler_params=pltpu.CompilerParams(
            dimension_semantics=("parallel", "arbitrary"),
            vmem_limit_bytes=vmem_limit),
        cost_estimate=cost,
    )(*inputs)
    return outs


# ----------------------------------------------------------------------------
# Tiny O(n^2) finalize on the per-core partials (plain JAX)
# ----------------------------------------------------------------------------
def _finalize_total(ppb, pt, s1, s2, llv, *, bs, n, sf, var_red):
    ppb = jnp.sum(ppb, axis=0)                 # (n, n) batch-summed K_pp
    pt_sum = jnp.sum(pt)
    pp_sum = jnp.sum(ppb)
    inv_pp = 1.0 / float(bs * (n * n - n))
    inv_pt = 1.0 / float(bs * n)
    pred_loss = pp_sum * inv_pp - 2.0 * pt_sum * inv_pt
    if not sf:
        return pred_loss
    s1_sum = jnp.sum(s1)
    s2_sum = jnp.sum(s2)
    if var_red:
        ll_vec = jnp.sum(llv, axis=0).reshape(1, n)
        pp_1 = jnp.sum(ppb, axis=0, keepdims=True)        # (1, n), leaves j
        pp_2 = jnp.sum(ppb, axis=1, keepdims=True)        # (n, 1), leaves i
        beta_pp = (pp_sum - pp_1 - pp_2 + ppb) / float(bs * (n * n - 3 * n + 3))
        beta_off = beta_pp * (1.0 - jnp.eye(n, dtype=beta_pp.dtype))
        # sum_{i!=j}(LL_i+LL_j)*beta_ij == 2*sum_j LL_j*colsum_j (beta symmetric)
        s_beta = 2.0 * jnp.sum(beta_off * ll_vec)
    else:
        s_beta = 0.0
    pp_mmd = (s1_sum - s_beta) * inv_pp
    pt_mmd = s2_sum * inv_pt
    return (pp_mmd - 2.0 * pt_mmd) + pred_loss


# ----------------------------------------------------------------------------
# Module-equivalent wrapper
# ----------------------------------------------------------------------------
class DiscrepancyLossPallas:
    def __init__(self, gradient_estimator="sf", variance_reduction=True,
                 sigma_sq=None):
        assert gradient_estimator in ("st", "sf")
        self.gradient_estimator = gradient_estimator
        self.variance_reduction = variance_reduction
        self.sigma_sq = sigma_sq    # deterministic RBF bandwidth; None -> D

    def __call__(self, y_pred, y_true, log_likelihoods):
        bs, n_adjs, n_nodes, out_feat = y_pred.shape
        D = n_nodes * out_feat
        sigma_sq = float(D) if self.sigma_sq is None else float(self.sigma_sq)
        assert n_adjs >= 2

        # TODO(synk): median (torch.quantile 0.5) kept in plain JAX (sort-based).
        pp_ae = jnp.abs(jnp.quantile(y_pred, 0.5, axis=1) - y_true)

        # Layout plumbing: flatten and zero-pad D to a lane-dense multiple of
        # 128 (padding changes neither dot products nor squared distances; the
        # ppse mean divides by the true D inside the kernel).
        dp = D if D % 128 == 0 else ((D + 127) // 128) * 128
        yp = y_pred.reshape(bs, n_adjs, D)
        yt = y_true.reshape(bs, 1, D)
        if dp != D:
            yp = jnp.pad(yp, ((0, 0), (0, 0), (0, dp - D)))
            yt = jnp.pad(yt, ((0, 0), (0, 0), (0, dp - D)))

        sf = self.gradient_estimator == "sf"
        if sf:
            ll_row = (log_likelihoods.sum(-1)
                      .astype(jnp.float32).reshape(bs, 1, n_adjs))
        else:
            ll_row = None   # no DMA of log_likelihoods in the 'st' path

        outs = fused_discrepancy_stats(
            yp, yt, ll_row, d_true=D, sigma_sq=sigma_sq,
            sf=sf, var_red=self.variance_reduction)
        if sf:
            ppse, ppb, pt, s1, s2, llv = outs
        else:
            ppse, ppb, pt = outs
            s1 = s2 = llv = None

        total = _finalize_total(ppb, pt, s1, s2, llv, bs=bs, n=n_adjs,
                                sf=sf, var_red=self.variance_reduction)
        metrics = {"point_prediction_ae": pp_ae,
                   "point_prediction_se": ppse.reshape(bs)}
        return total, metrics


# ----------------------------------------------------------------------------
# Pure-JAX reference (mirrors the PyTorch forward)
# ----------------------------------------------------------------------------
def reference_loss(y_pred, y_true, log_likelihoods, gradient_estimator,
                   variance_reduction, sigma_sq):
    bs, n_adjs, n_nodes, out_feat = y_pred.shape
    pp_ae = jnp.abs(jnp.quantile(y_pred, 0.5, axis=1) - y_true)
    pp_se = jnp.mean((jnp.mean(y_pred, axis=1) - y_true) ** 2, axis=(-1, -2))

    yp = y_pred.reshape(bs, n_adjs, -1)
    yt = y_true.reshape(bs, 1, -1)
    ll = log_likelihoods.sum(-1)

    def kvec(a, b):
        d = jnp.sum((a[:, :, None, :] - b[:, None, :, :]) ** 2, axis=-1)
        return jnp.exp(-d / (2.0 * sigma_sq))

    eye = jnp.eye(n_adjs)
    ppk = kvec(yp, yp) * (1.0 - eye)
    ptk = kvec(yp, yt)[..., 0]

    pp_pred = ppk.sum() / (bs * (n_adjs ** 2 - n_adjs))
    pt_pred = ptk.sum() / (bs * n_adjs)
    if gradient_estimator == "st":
        total = pp_pred - 2.0 * pt_pred
    else:
        ll_mat = (ll[:, :, None] + ll[:, None, :]) * (1.0 - eye)
        if variance_reduction:
            pp_sum = ppk.sum()
            pp_1 = ppk.sum(axis=(0, 1), keepdims=True)
            pp_2 = ppk.sum(axis=(0, 2), keepdims=True)
            pp_b = ppk.sum(axis=0, keepdims=True)
            beta_pp = (pp_sum - pp_1 - pp_2 + pp_b) / (bs * (n_adjs ** 2 - 3 * n_adjs + 3))
            beta_pt = (ptk.sum(-1, keepdims=True) - ptk) / (n_adjs - 1)
        else:
            beta_pp, beta_pt = 0.0, 0.0
        pp_mmd = (ll_mat * (ppk - beta_pp)).sum() / (bs * (n_adjs ** 2 - n_adjs))
        pt_mmd = (ll * (ptk - beta_pt)).sum() / (bs * n_adjs)
        total = (pp_mmd - 2.0 * pt_mmd) + (pp_pred - 2.0 * pt_pred)
    return total, pp_ae, pp_se


# ----------------------------------------------------------------------------
if __name__ == "__main__":
    bs, n_adjs, n_nodes, out_feat = 2, 8, 16, 4
    ll_dim = n_nodes

    key = jax.random.PRNGKey(0)
    k1, k2, k3 = jax.random.split(key, 3)
    y_pred = jax.random.normal(k1, (bs, n_adjs, n_nodes, out_feat), jnp.float32)
    y_true = jax.random.normal(k2, (bs, n_nodes, out_feat), jnp.float32)
    log_likelihoods = jax.random.normal(k3, (bs, n_adjs, ll_dim), jnp.float32) * 0.1

    D = n_nodes * out_feat
    sigma_sq = float(D)  # deterministic kernel bandwidth

    for grad_est, var_red in [("sf", True), ("sf", False), ("st", False)]:
        loss_fn = DiscrepancyLossPallas(gradient_estimator=grad_est,
                                        variance_reduction=var_red,
                                        sigma_sq=sigma_sq)
        total, metrics = loss_fn(y_pred, y_true, log_likelihoods)
        total = jax.block_until_ready(total)
        metrics = jax.block_until_ready(metrics)

        ref_total, ref_ae, ref_se = reference_loss(
            y_pred, y_true, log_likelihoods, grad_est, var_red, sigma_sq)

        np.testing.assert_allclose(np.asarray(total), np.asarray(ref_total),
                                   rtol=1e-4, atol=1e-5)
        np.testing.assert_allclose(np.asarray(metrics["point_prediction_se"]),
                                   np.asarray(ref_se), rtol=1e-4, atol=1e-5)
        np.testing.assert_allclose(np.asarray(metrics["point_prediction_ae"]),
                                   np.asarray(ref_ae), rtol=1e-4, atol=1e-5)

    print("KERNEL_OK")
</pallas_src>

<mosaic_0001>
module attributes {stable_mosaic.version = 11 : i64} {
  func.func @_discrepancy_kernel(%arg0: i32, %arg1: i32, %arg2: memref<2x8x128xf32, #tpu.memory_space<vmem>>, %arg3: memref<2x1x128xf32, #tpu.memory_space<vmem>>, %arg4: memref<2x1x8xf32, #tpu.memory_space<vmem>>, %arg5: memref<2x1x1xf32, #tpu.memory_space<vmem>>, %arg6: memref<1x8x8xf32, #tpu.memory_space<vmem>>, %arg7: memref<1x1x1xf32, #tpu.memory_space<vmem>>, %arg8: memref<1x1x1xf32, #tpu.memory_space<vmem>>, %arg9: memref<1x1x1xf32, #tpu.memory_space<vmem>>, %arg10: memref<1x1x8xf32, #tpu.memory_space<vmem>>, %arg11: memref<8x8xf32, #tpu.memory_space<vmem>>, %arg12: memref<1x1xf32, #tpu.memory_space<vmem>>, %arg13: memref<1x1xf32, #tpu.memory_space<vmem>>, %arg14: memref<1x1xf32, #tpu.memory_space<vmem>>, %arg15: memref<1x8xf32, #tpu.memory_space<vmem>>) attributes {dimension_semantics = [#tpu.dimension_semantics<parallel>, #tpu.dimension_semantics<arbitrary>], iteration_bounds = array<i64: 1, 1>, scalar_prefetch = 0 : i64, scratch_operands = 5 : i64, tpu.core_type = #tpu.core_type<tc>, window_params = [{transform_indices = @transform_0, window_bounds = array<i64: 2, 8, 128>}, {transform_indices = @transform_1, window_bounds = array<i64: 2, 1, 128>}, {transform_indices = @transform_2, window_bounds = array<i64: 2, 1, 8>}, {transform_indices = @transform_3, window_bounds = array<i64: 2, 1, 1>}, {transform_indices = @transform_4, window_bounds = array<i64: 1, 8, 8>}, {transform_indices = @transform_5, window_bounds = array<i64: 1, 1, 1>}, {transform_indices = @transform_6, window_bounds = array<i64: 1, 1, 1>}, {transform_indices = @transform_7, window_bounds = array<i64: 1, 1, 1>}, {transform_indices = @transform_8, window_bounds = array<i64: 1, 1, 8>}]} {
    %c0_i32 = arith.constant 0 : i32
    %0 = arith.cmpi eq, %arg1, %c0_i32 : i32
    %1 = arith.extui %0 : i1 to i32
    %c0_i32_0 = arith.constant 0 : i32
    %2 = arith.cmpi ne, %1, %c0_i32_0 : i32
    scf.if %2 {
      %cst_61 = arith.constant 0.000000e+00 : f32
      %109 = vector.broadcast %cst_61 : f32 to vector<8x8xf32>
      %c0_62 = arith.constant 0 : index
      %c0_63 = arith.constant 0 : index
      %110 = vector.load %arg11[%c0_62, %c0_63] : memref<8x8xf32, #tpu.memory_space<vmem>>, vector<8x8xf32>
      tpu.vector_store %arg11[%c0_62, %c0_63], %109 {strides = array<i32>} : memref<8x8xf32, #tpu.memory_space<vmem>>, vector<8x8xf32>,
      %cst_64 = arith.constant 0.000000e+00 : f32
      %111 = vector.broadcast %cst_64 : f32 to vector<1x1xf32>
      %c0_65 = arith.constant 0 : index
      %c0_66 = arith.constant 0 : index
      %112 = vector.load %arg12[%c0_65, %c0_66] : memref<1x1xf32, #tpu.memory_space<vmem>>, vector<1x1xf32>
      tpu.vector_store %arg12[%c0_65, %c0_66], %111 {strides = array<i32>} : memref<1x1xf32, #tpu.memory_space<vmem>>, vector<1x1xf32>,
      %cst_67 = arith.constant 0.000000e+00 : f32
      %113 = vector.broadcast %cst_67 : f32 to vector<1x1xf32>
      %c0_68 = arith.constant 0 : index
      %c0_69 = arith.constant 0 : index
      %114 = vector.load %arg13[%c0_68, %c0_69] : memref<1x1xf32, #tpu.memory_space<vmem>>, vector<1x1xf32>
      tpu.vector_store %arg13[%c0_68, %c0_69], %113 {strides = array<i32>} : memref<1x1xf32, #tpu.memory_space<vmem>>, vector<1x1xf32>,
      %cst_70 = arith.constant 0.000000e+00 : f32
      %115 = vector.broadcast %cst_70 : f32 to vector<1x1xf32>
      %c0_71 = arith.constant 0 : index
      %c0_72 = arith.constant 0 : index
      %116 = vector.load %arg14[%c0_71, %c0_72] : memref<1x1xf32, #tpu.memory_space<vmem>>, vector<1x1xf32>
      tpu.vector_store %arg14[%c0_71, %c0_72], %115 {strides = array<i32>} : memref<1x1xf32, #tpu.memory_space<vmem>>, vector<1x1xf32>,
      %cst_73 = arith.constant 0.000000e+00 : f32
      %117 = vector.broadcast %cst_73 : f32 to vector<1x8xf32>
      %c0_74 = arith.constant 0 : index
      %c0_75 = arith.constant 0 : index
      %118 = vector.load %arg15[%c0_74, %c0_75] : memref<1x8xf32, #tpu.memory_space<vmem>>, vector<1x8xf32>
      tpu.vector_store %arg15[%c0_74, %c0_75], %117 {strides = array<i32>} : memref<1x8xf32, #tpu.memory_space<vmem>>, vector<1x8xf32>,
    } else {
    }
    %c0 = arith.constant 0 : index
    %c0_1 = arith.constant 0 : index
    %c0_2 = arith.constant 0 : index
    %3 = vector.load %arg2[%c0, %c0_1, %c0_2] : memref<2x8x128xf32, #tpu.memory_space<vmem>>, vector<2x8x128xf32>
    %c0_3 = arith.constant 0 : index
    %c0_4 = arith.constant 0 : index
    %c0_5 = arith.constant 0 : index
    %4 = vector.load %arg3[%c0_3, %c0_4, %c0_5] : memref<2x1x128xf32, #tpu.memory_space<vmem>>, vector<2x1x128xf32>
    "tpu.trace_start"() <{level = 10 : i32, message = "bid,bjd->bij"}> : () -> ()
    %cst = arith.constant dense<0.000000e+00> : vector<2x8x8xf32>
    %5 = tpu.matmul %3, %3, %cst {dimension_numbers = #tpu.dot_dimension_numbers<[2], [2], [1], [1], [0, 0, 0, 1, 1, 1], [0], [0]>, precision = #tpu.contract_precision<fp32>} : vector<2x8x128xf32>, vector<2x8x128xf32>, vector<2x8x8xf32> -> vector<2x8x8xf32>
    "tpu.trace_stop"() : () -> ()
    "tpu.trace_start"() <{level = 10 : i32, message = "bod,bjd->boj"}> : () -> ()
    %cst_6 = arith.constant dense<0.000000e+00> : vector<2x1x8xf32>
    %6 = tpu.matmul %4, %3, %cst_6 {dimension_numbers = #tpu.dot_dimension_numbers<[2], [2], [1], [1], [0, 0, 0, 1, 1, 1], [0], [0]>, precision = #tpu.contract_precision<fp32>} : vector<2x1x128xf32>, vector<2x8x128xf32>, vector<2x1x8xf32> -> vector<2x1x8xf32>
    "tpu.trace_stop"() : () -> ()
    %7 = tpu.iota {dimensions = array<i32: 0>} : vector<8x8xi32>
    %8 = tpu.iota {dimensions = array<i32: 1>} : vector<8x8xi32>
    %9 = arith.cmpi eq, %7, %8 : vector<8x8xi32>
    %cst_7 = arith.constant 0.000000e+00 : f32
    %10 = vector.shape_cast %9 : vector<8x8xi1> to vector<1x8x8xi1>
    %11 = vector.broadcast %10 : vector<1x8x8xi1> to vector<2x8x8xi1>
    %12 = vector.broadcast %cst_7 : f32 to vector<2x8x8xf32>
    %13 = arith.select %11, %5, %12 : vector<2x8x8xi1>, vector<2x8x8xf32>
    %cst_8 = arith.constant dense<0.000000e+00> : vector<2x8xf32>
    %14 = vector.multi_reduction <add>, %13, %cst_8 [2] : vector<2x8x8xf32> to vector<2x8xf32>
    %15 = vector.shape_cast %14 : vector<2x8xf32> to vector<2x8x1xf32>
    %cst_9 = arith.constant dense<0.000000e+00> : vector<2x8xf32>
    %16 = vector.multi_reduction <add>, %13, %cst_9 [1] : vector<2x8x8xf32> to vector<2x8xf32>
    %17 = vector.shape_cast %16 : vector<2x8xf32> to vector<2x1x8xf32>
    %18 = arith.mulf %4, %4 : vector<2x1x128xf32>
    %cst_10 = arith.constant dense<0.000000e+00> : vector<2x1xf32>
    %19 = vector.multi_reduction <add>, %18, %cst_10 [2] : vector<2x1x128xf32> to vector<2x1xf32>
    %20 = vector.shape_cast %19 : vector<2x1xf32> to vector<2x1x1xf32>
    %21 = vector.broadcast %15 : vector<2x8x1xf32> to vector<2x8x8xf32>
    %22 = vector.broadcast %17 : vector<2x1x8xf32> to vector<2x8x8xf32>
    %23 = arith.addf %21, %22 : vector<2x8x8xf32>
    %cst_11 = arith.constant 2.000000e+00 : f32
    %24 = vector.broadcast %cst_11 : f32 to vector<2x8x8xf32>
    %25 = arith.mulf %24, %5 : vector<2x8x8xf32>
    %26 = arith.subf %23, %25 : vector<2x8x8xf32>
    %cst_12 = arith.constant 0.000000e+00 : f32
    %27 = vector.broadcast %cst_12 : f32 to vector<2x8x8xf32>
    %28 = arith.maximumf %26, %27 : vector<2x8x8xf32>
    %cst_13 = arith.constant 0.000000e+00 : f32
    %29 = vector.broadcast %cst_13 : f32 to vector<2x8x8xf32>
    %30 = arith.subf %29, %28 : vector<2x8x8xf32>
    %cst_14 = arith.constant 7.812500e-03 : f32
    %31 = vector.broadcast %cst_14 : f32 to vector<2x8x8xf32>
    %32 = arith.mulf %30, %31 : vector<2x8x8xf32>
    %33 = math.exp %32 : vector<2x8x8xf32>
    %cst_15 = arith.constant 0.000000e+00 : f32
    %34 = vector.shape_cast %9 : vector<8x8xi1> to vector<1x8x8xi1>
    %35 = vector.broadcast %34 : vector<1x8x8xi1> to vector<2x8x8xi1>
    %36 = vector.broadcast %cst_15 : f32 to vector<2x8x8xf32>
    %37 = arith.select %35, %36, %33 : vector<2x8x8xi1>, vector<2x8x8xf32>
    %38 = vector.broadcast %20 : vector<2x1x1xf32> to vector<2x1x8xf32>
    %39 = arith.addf %17, %38 : vector<2x1x8xf32>
    %cst_16 = arith.constant 2.000000e+00 : f32
    %40 = vector.broadcast %cst_16 : f32 to vector<2x1x8xf32>
    %41 = arith.mulf %40, %6 : vector<2x1x8xf32>
    %42 = arith.subf %39, %41 : vector<2x1x8xf32>
    %cst_17 = arith.constant 0.000000e+00 : f32
    %43 = vector.broadcast %cst_17 : f32 to vector<2x1x8xf32>
    %44 = arith.maximumf %42, %43 : vector<2x1x8xf32>
    %cst_18 = arith.constant 0.000000e+00 : f32
    %45 = vector.broadcast %cst_18 : f32 to vector<2x1x8xf32>
    %46 = arith.subf %45, %44 : vector<2x1x8xf32>
    %cst_19 = arith.constant 7.812500e-03 : f32
    %47 = vector.broadcast %cst_19 : f32 to vector<2x1x8xf32>
    %48 = arith.mulf %46, %47 : vector<2x1x8xf32>
    %49 = math.exp %48 : vector<2x1x8xf32>
    %c0_20 = arith.constant 0 : index
    %c0_21 = arith.constant 0 : index
    %50 = vector.load %arg11[%c0_20, %c0_21] : memref<8x8xf32, #tpu.memory_space<vmem>>, vector<8x8xf32>
    %cst_22 = arith.constant dense<0.000000e+00> : vector<8x8xf32>
    %51 = vector.multi_reduction <add>, %37, %cst_22 [0] : vector<2x8x8xf32> to vector<8x8xf32>
    %52 = arith.addf %50, %51 : vector<8x8xf32>
    %c0_23 = arith.constant 0 : index
    %c0_24 = arith.constant 0 : index
    %53 = vector.load %arg11[%c0_23, %c0_24] : memref<8x8xf32, #tpu.memory_space<vmem>>, vector<8x8xf32>
    tpu.vector_store %arg11[%c0_23, %c0_24], %52 {strides = array<i32>} : memref<8x8xf32, #tpu.memory_space<vmem>>, vector<8x8xf32>,
    %c0_25 = arith.constant 0 : index
    %c0_26 = arith.constant 0 : index
    %54 = vector.load %arg12[%c0_25, %c0_26] : memref<1x1xf32, #tpu.memory_space<vmem>>, vector<1x1xf32>
    %55 = vector.shape_cast %49 : vector<2x1x8xf32> to vector<1x2x1x8xf32>
    %cst_27 = arith.constant dense<0.000000e+00> : vector<1xf32>
    %56 = vector.multi_reduction <add>, %55, %cst_27 [1, 2, 3] : vector<1x2x1x8xf32> to vector<1xf32>
    %57 = vector.shape_cast %56 : vector<1xf32> to vector<1x1x1x1xf32>
    %58 = vector.extract %57[0, 0, 0, 0] : f32 from vector<1x1x1x1xf32>
    %59 = vector.broadcast %58 : f32 to vector<1x1xf32>
    %60 = arith.addf %54, %59 : vector<1x1xf32>
    %c0_28 = arith.constant 0 : index
    %c0_29 = arith.constant 0 : index
    %61 = vector.load %arg12[%c0_28, %c0_29] : memref<1x1xf32, #tpu.memory_space<vmem>>, vector<1x1xf32>
    tpu.vector_store %arg12[%c0_28, %c0_29], %60 {strides = array<i32>} : memref<1x1xf32, #tpu.memory_space<vmem>>, vector<1x1xf32>,
    %c0_30 = arith.constant 0 : index
    %c0_31 = arith.constant 0 : index
    %c0_32 = arith.constant 0 : index
    %62 = vector.load %arg4[%c0_30, %c0_31, %c0_32] : memref<2x1x8xf32, #tpu.memory_space<vmem>>, vector<2x1x8xf32>
    %cst_33 = arith.constant dense<0.000000e+00> : vector<2x8xf32>
    %63 = vector.multi_reduction <add>, %37, %cst_33 [1] : vector<2x8x8xf32> to vector<2x8xf32>
    %64 = vector.shape_cast %63 : vector<2x8xf32> to vector<2x1x8xf32>
    %c0_34 = arith.constant 0 : index
    %c0_35 = arith.constant 0 : index
    %65 = vector.load %arg13[%c0_34, %c0_35] : memref<1x1xf32, #tpu.memory_space<vmem>>, vector<1x1xf32>
    %66 = arith.mulf %62, %64 : vector<2x1x8xf32>
    %67 = vector.shape_cast %66 : vector<2x1x8xf32> to vector<1x2x1x8xf32>
    %cst_36 = arith.constant dense<0.000000e+00> : vector<1xf32>
    %68 = vector.multi_reduction <add>, %67, %cst_36 [1, 2, 3] : vector<1x2x1x8xf32> to vector<1xf32>
    %69 = vector.shape_cast %68 : vector<1xf32> to vector<1x1x1x1xf32>
    %70 = vector.extract %69[0, 0, 0, 0] : f32 from vector<1x1x1x1xf32>
    %cst_37 = arith.constant 2.000000e+00 : f32
    %71 = arith.mulf %cst_37, %70 : f32
    %72 = vector.broadcast %71 : f32 to vector<1x1xf32>
    %73 = arith.addf %65, %72 : vector<1x1xf32>
    %c0_38 = arith.constant 0 : index
    %c0_39 = arith.constant 0 : index
    %74 = vector.load %arg13[%c0_38, %c0_39] : memref<1x1xf32, #tpu.memory_space<vmem>>, vector<1x1xf32>
    tpu.vector_store %arg13[%c0_38, %c0_39], %73 {strides = array<i32>} : memref<1x1xf32, #tpu.memory_space<vmem>>, vector<1x1xf32>,
    %cst_40 = arith.constant dense<0.000000e+00> : vector<2x1xf32>
    %75 = vector.multi_reduction <add>, %49, %cst_40 [2] : vector<2x1x8xf32> to vector<2x1xf32>
    %76 = vector.shape_cast %75 : vector<2x1xf32> to vector<2x1x1xf32>
    %77 = vector.broadcast %76 : vector<2x1x1xf32> to vector<2x1x8xf32>
    %78 = arith.subf %77, %49 : vector<2x1x8xf32>
    %cst_41 = arith.constant 0.142857149 : f32
    %79 = vector.broadcast %cst_41 : f32 to vector<2x1x8xf32>
    %80 = arith.mulf %78, %79 : vector<2x1x8xf32>
    %c0_42 = arith.constant 0 : index
    %c0_43 = arith.constant 0 : index
    %81 = vector.load %arg14[%c0_42, %c0_43] : memref<1x1xf32, #tpu.memory_space<vmem>>, vector<1x1xf32>
    %82 = arith.subf %49, %80 : vector<2x1x8xf32>
    %83 = arith.mulf %62, %82 : vector<2x1x8xf32>
    %84 = vector.shape_cast %83 : vector<2x1x8xf32> to vector<1x2x1x8xf32>
    %cst_44 = arith.constant dense<0.000000e+00> : vector<1xf32>
    %85 = vector.multi_reduction <add>, %84, %cst_44 [1, 2, 3] : vector<1x2x1x8xf32> to vector<1xf32>
    %86 = vector.shape_cast %85 : vector<1xf32> to vector<1x1x1x1xf32>
    %87 = vector.extract %86[0, 0, 0, 0] : f32 from vector<1x1x1x1xf32>
    %88 = vector.broadcast %87 : f32 to vector<1x1xf32>
    %89 = arith.addf %81, %88 : vector<1x1xf32>
    %c0_45 = arith.constant 0 : index
    %c0_46 = arith.constant 0 : index
    %90 = vector.load %arg14[%c0_45, %c0_46] : memref<1x1xf32, #tpu.memory_space<vmem>>, vector<1x1xf32>
    tpu.vector_store %arg14[%c0_45, %c0_46], %89 {strides = array<i32>} : memref<1x1xf32, #tpu.memory_space<vmem>>, vector<1x1xf32>,
    %c0_47 = arith.constant 0 : index
    %c0_48 = arith.constant 0 : index
    %91 = vector.load %arg15[%c0_47, %c0_48] : memref<1x8xf32, #tpu.memory_space<vmem>>, vector<1x8xf32>
    %cst_49 = arith.constant dense<0.000000e+00> : vector<1x8xf32>
    %92 = vector.multi_reduction <add>, %62, %cst_49 [0] : vector<2x1x8xf32> to vector<1x8xf32>
    %93 = arith.addf %91, %92 : vector<1x8xf32>
    %c0_50 = arith.constant 0 : index
    %c0_51 = arith.constant 0 : index
    %94 = vector.load %arg15[%c0_50, %c0_51] : memref<1x8xf32, #tpu.memory_space<vmem>>, vector<1x8xf32>
    tpu.vector_store %arg15[%c0_50, %c0_51], %93 {strides = array<i32>} : memref<1x8xf32, #tpu.memory_space<vmem>>, vector<1x8xf32>,
    %cst_52 = arith.constant dense<0.000000e+00> : vector<2x128xf32>
    %95 = vector.multi_reduction <add>, %3, %cst_52 [1] : vector<2x8x128xf32> to vector<2x128xf32>
    %96 = vector.shape_cast %95 : vector<2x128xf32> to vector<2x1x128xf32>
    %cst_53 = arith.constant 8.000000e+00 : f32
    %97 = vector.broadcast %cst_53 : f32 to vector<2x1x128xf32>
    %98 = arith.divf %96, %97 : vector<2x1x128xf32>
    %99 = arith.subf %98, %4 : vector<2x1x128xf32>
    %100 = arith.mulf %99, %99 : vector<2x1x128xf32>
    %cst_54 = arith.constant dense<0.000000e+00> : vector<2x1xf32>
    %101 = vector.multi_reduction <add>, %100, %cst_54 [2] : vector<2x1x128xf32> to vector<2x1xf32>
    %102 = vector.shape_cast %101 : vector<2x1xf32> to vector<2x1x1xf32>
    %cst_55 = arith.constant 1.562500e-02 : f32
    %103 = vector.broadcast %cst_55 : f32 to vector<2x1x1xf32>
    %104 = arith.mulf %102, %103 : vector<2x1x1xf32>
    %c0_56 = arith.constant 0 : index
    %c0_57 = arith.constant 0 : index
    %c0_58 = arith.constant 0 : index
    %105 = vector.load %arg5[%c0_56, %c0_57, %c0_58] : memref<2x1x1xf32, #tpu.memory_space<vmem>>, vector<2x1x1xf32>
    tpu.vector_store %arg5[%c0_56, %c0_57, %c0_58], %104 {strides = array<i32>} : memref<2x1x1xf32, #tpu.memory_space<vmem>>, vector<2x1x1xf32>,
    %c0_i32_59 = arith.constant 0 : i32
    %106 = arith.cmpi eq, %arg1, %c0_i32_59 : i32
    %107 = arith.extui %106 : i1 to i32
    %c0_i32_60 = arith.constant 0 : i32
    %108 = arith.cmpi ne, %107, %c0_i32_60 : i32
    scf.if %108 {
      %c0_61 = arith.constant 0 : index
      %c0_62 = arith.constant 0 : index
      %109 = vector.load %arg11[%c0_61, %c0_62] : memref<8x8xf32, #tpu.memory_space<vmem>>, vector<8x8xf32>
      %110 = vector.shape_cast %109 : vector<8x8xf32> to vector<1x8x8xf32>
      %c0_63 = arith.constant 0 : index
      %c0_64 = arith.constant 0 : index
      %c0_65 = arith.constant 0 : index
      %111 = vector.load %arg6[%c0_63, %c0_64, %c0_65] : memref<1x8x8xf32, #tpu.memory_space<vmem>>, vector<1x8x8xf32>
      tpu.vector_store %arg6[%c0_63, %c0_64, %c0_65], %110 {strides = array<i32>} : memref<1x8x8xf32, #tpu.memory_space<vmem>>, vector<1x8x8xf32>,
      %c0_66 = arith.constant 0 : index
      %c0_67 = arith.constant 0 : index
      %112 = vector.load %arg12[%c0_66, %c0_67] : memref<1x1xf32, #tpu.memory_space<vmem>>, vector<1x1xf32>
      %113 = vector.shape_cast %112 : vector<1x1xf32> to vector<1x1x1xf32>
      %c0_68 = arith.constant 0 : index
      %c0_69 = arith.constant 0 : index
      %c0_70 = arith.constant 0 : index
      %114 = vector.load %arg7[%c0_68, %c0_69, %c0_70] : memref<1x1x1xf32, #tpu.memory_space<vmem>>, vector<1x1x1xf32>
      tpu.vector_store %arg7[%c0_68, %c0_69, %c0_70], %113 {strides = array<i32>} : memref<1x1x1xf32, #tpu.memory_space<vmem>>, vector<1x1x1xf32>,
      %c0_71 = arith.constant 0 : index
      %c0_72 = arith.constant 0 : index
      %115 = vector.load %arg13[%c0_71, %c0_72] : memref<1x1xf32, #tpu.memory_space<vmem>>, vector<1x1xf32>
      %116 = vector.shape_cast %115 : vector<1x1xf32> to vector<1x1x1xf32>
      %c0_73 = arith.constant 0 : index
      %c0_74 = arith.constant 0 : index
      %c0_75 = arith.constant 0 : index
      %117 = vector.load %arg8[%c0_73, %c0_74, %c0_75] : memref<1x1x1xf32, #tpu.memory_space<vmem>>, vector<1x1x1xf32>
      tpu.vector_store %arg8[%c0_73, %c0_74, %c0_75], %116 {strides = array<i32>} : memref<1x1x1xf32, #tpu.memory_space<vmem>>, vector<1x1x1xf32>,
      %c0_76 = arith.constant 0 : index
      %c0_77 = arith.constant 0 : index
      %118 = vector.load %arg14[%c0_76, %c0_77] : memref<1x1xf32, #tpu.memory_space<vmem>>, vector<1x1xf32>
      %119 = vector.shape_cast %118 : vector<1x1xf32> to vector<1x1x1xf32>
      %c0_78 = arith.constant 0 : index
      %c0_79 = arith.constant 0 : index
      %c0_80 = arith.constant 0 : index
      %120 = vector.load %arg9[%c0_78, %c0_79, %c0_80] : memref<1x1x1xf32, #tpu.memory_space<vmem>>, vector<1x1x1xf32>
      tpu.vector_store %arg9[%c0_78, %c0_79, %c0_80], %119 {strides = array<i32>} : memref<1x1x1xf32, #tpu.memory_space<vmem>>, vector<1x1x1xf32>,
      %c0_81 = arith.constant 0 : index
      %c0_82 = arith.constant 0 : index
      %121 = vector.load %arg15[%c0_81, %c0_82] : memref<1x8xf32, #tpu.memory_space<vmem>>, vector<1x8xf32>
      %122 = vector.shape_cast %121 : vector<1x8xf32> to vector<1x1x8xf32>
      %c0_83 = arith.constant 0 : index
      %c0_84 = arith.constant 0 : index
      %c0_85 = arith.constant 0 : index
      %123 = vector.load %arg10[%c0_83, %c0_84, %c0_85] : memref<1x1x8xf32, #tpu.memory_space<vmem>>, vector<1x1x8xf32>
      tpu.vector_store %arg10[%c0_83, %c0_84, %c0_85], %122 {strides = array<i32>} : memref<1x1x8xf32, #tpu.memory_space<vmem>>, vector<1x1x8xf32>,
    } else {
    }
    return
  }
  func.func @transform_0(%arg0: i32, %arg1: i32) -> (i32, i32, i32) {
    %c1_i32 = arith.constant 1 : i32
    %0 = arith.muli %arg0, %c1_i32 : i32
    %1 = arith.addi %0, %arg1 : i32
    %c0_i32 = arith.constant 0 : i32
    %c0_i32_0 = arith.constant 0 : i32
    %c0_i32_1 = arith.constant 0 : i32
    return %1, %c0_i32, %c0_i32_0 : i32, i32, i32
  }
  func.func @transform_1(%arg0: i32, %arg1: i32) -> (i32, i32, i32) {
    %c1_i32 = arith.constant 1 : i32
    %0 = arith.muli %arg0, %c1_i32 : i32
    %1 = arith.addi %0, %arg1 : i32
    %c0_i32 = arith.constant 0 : i32
    %c0_i32_0 = arith.constant 0 : i32
    %c0_i32_1 = arith.constant 0 : i32
    return %1, %c0_i32, %c0_i32_0 : i32, i32, i32
  }
  func.func @transform_2(%arg0: i32, %arg1: i32) -> (i32, i32, i32) {
    %c1_i32 = arith.constant 1 : i32
    %0 = arith.muli %arg0, %c1_i32 : i32
    %1 = arith.addi %0, %arg1 : i32
    %c0_i32 = arith.constant 0 : i32
    %c0_i32_0 = arith.constant 0 : i32
    %c0_i32_1 = arith.constant 0 : i32
    return %1, %c0_i32, %c0_i32_0 : i32, i32, i32
  }
  func.func @transform_3(%arg0: i32, %arg1: i32) -> (i32, i32, i32) {
    %c1_i32 = arith.constant 1 : i32
    %0 = arith.muli %arg0, %c1_i32 : i32
    %1 = arith.addi %0, %arg1 : i32
    %c0_i32 = arith.constant 0 : i32
    %c0_i32_0 = arith.constant 0 : i32
    %c0_i32_1 = arith.constant 0 : i32
    return %1, %c0_i32, %c0_i32_0 : i32, i32, i32
  }
  func.func @transform_4(%arg0: i32, %arg1: i32) -> (i32, i32, i32) {
    %c0_i32 = arith.constant 0 : i32
    %c0_i32_0 = arith.constant 0 : i32
    %c0_i32_1 = arith.constant 0 : i32
    return %arg0, %c0_i32, %c0_i32_0 : i32, i32, i32
  }
  func.func @transform_5(%arg0: i32, %arg1: i32) -> (i32, i32, i32) {
    %c0_i32 = arith.constant 0 : i32
    %c0_i32_0 = arith.constant 0 : i32
    %c0_i32_1 = arith.constant 0 : i32
    return %arg0, %c0_i32, %c0_i32_0 : i32, i32, i32
  }
  func.func @transform_6(%arg0: i32, %arg1: i32) -> (i32, i32, i32) {
    %c0_i32 = arith.constant 0 : i32
    %c0_i32_0 = arith.constant 0 : i32
    %c0_i32_1 = arith.constant 0 : i32
    return %arg0, %c0_i32, %c0_i32_0 : i32, i32, i32
  }
  func.func @transform_7(%arg0: i32, %arg1: i32) -> (i32, i32, i32) {
    %c0_i32 = arith.constant 0 : i32
    %c0_i32_0 = arith.constant 0 : i32
    %c0_i32_1 = arith.constant 0 : i32
    return %arg0, %c0_i32, %c0_i32_0 : i32, i32, i32
  }
  func.func @transform_8(%arg0: i32, %arg1: i32) -> (i32, i32, i32) {
    %c0_i32 = arith.constant 0 : i32
    %c0_i32_0 = arith.constant 0 : i32
    %c0_i32_1 = arith.constant 0 : i32
    return %arg0, %c0_i32, %c0_i32_0 : i32, i32, i32
  }
}

</mosaic_0001>

<bundles_post_ra>
// kernel: tpu_custom_call.1
= control target key start
LH: loop header
LB: loop body
LE: loop exit
PB: predicated region body
PF: predicated region fallthrough
CT: control target
= control target key end

     0   :  { %14 = vsyncpa [#allocation8], 0  ;;  %s2961_s0 = inlined_call_operand.hbm [shape: f32[2,8,128], index: 0, kind: input, shape index: {}]   ;;  %s2962_s1 = inlined_call_operand.vmem [shape: f32[2,1,128], index: 1, kind: input, shape index: {}]   ;;  %s2963_s2 = inlined_call_operand.vmem [shape: f32[2,1,8], index: 2, kind: input, shape index: {}]   ;;  %s2964_s3 = inlined_call_operand.vmem [shape: f32[2,1,1], index: 3, kind: output, shape index: {0}]   ;;  %s2965_s4 = inlined_call_operand.hbm [shape: f32[1,8,8], index: 4, kind: output, shape index: {1}]   ;;  %s2966_s5 = inlined_call_operand.hbm [shape: f32[1,1,1], index: 5, kind: output, shape index: {2}]   ;;  %s2967_s6 = inlined_call_operand.hbm [shape: f32[1,1,1], index: 6, kind: output, shape index: {3}]   ;;  %s2968_s7 = inlined_call_operand.hbm [shape: f32[1,1,1], index: 7, kind: output, shape index: {4}]   ;;  %s2969_s8 = inlined_call_operand.hbm [shape: f32[1,1,8], index: 8, kind: output, shape index: {5}]  }
   0x1   :  { %15 = vsyncpa [#allocation9], 0 }
   0x2   :  { %16 = vsyncpa [#allocation12], 0 }
   0x3   :  { %17 = vsyncpa [#allocation15], 0  ;;  %s2564_s27 = smov [#allocation7]   ;;  %s2424_s9 = scalar_lea.hbm %s2961_s0, 256 }
   0x4   :  { %s27_s28 = sshll.u32 %s2564_s27, 4  ;;  %p2425_p0 = scmp.ne.s32.totalorder %s2961_s0, %s2424_s9  ;;  %s28_s28 = int_to_ptr.vmem [resolvable:$true] %s27_s28 }
   0x5   :  { %p2428_p1 = scmp.lt.u32.totalorder %s2424_s9, %s2961_s0 }
   0x7   :  { %p2430_p2 = pnand %p2428_p1, %p2425_p0 }
   0x9   :  { %2433 = shalt.err (!%p2430_p2)
}
   0xa   :  { %s2434_s14 = scalar_lea.vmem %s28_s28, 256  ;;  %p2439_p4 = scmp.lt.s32.totalorder %s28_s28, %s28_s28 }
   0xb   :  { %p2435_p3 = scmp.ne.s32.totalorder %s28_s28, %s2434_s14  ;;  %p2440_p5 = scmp.lt.s32.totalorder %s2434_s14, %s2434_s14 }
   0xd   :  { %p2441_p6 = por %p2440_p5, %p2439_p4 }
   0xf   :  { %p2442_p7 = pnand %p2441_p6, %p2435_p3 }
  0x11   :  { %2445 = shalt.err (!%p2442_p7)
}
  0x12   :  { %s2565_s15 = smov 128   ;;  %s2566_s16 = smov 8  }
  0x13   :  { %33 = dma.hbm_to_vmem [thread:$0]  %s2961_s0, 256, %s28_s28, [#allocation8], %s2565_s15, %s2565_s15, %s2566_s16  }
  0x14   :  { %2556 = dma.done.wait [#allocation8], 256  }
  0x15   :  { %2557 = vsyncadd [#allocation8], 4294967040  ;;  %v2567_v0 = vmov 0.0   ;;  %vm2568_vm0 = vmmov 0   ;;  %v2637_v1 = vld [vmem:[#allocation7] sm:$0xff]  ;;  %v2639_v2 = vld [vmem:[#allocation7 + $0x8] sm:$0xff]  ;;  %v1893_v29 = vlaneseq }
  0x16   :  { %2240 = vmatprep.subr.mxu0 %v2567_v0  ;;  %2270 = vmatprep.subr.mxu1 %v2567_v0  ;;  %v2644_v3 = vld [vmem:[%s2962_s1] sm:$0x1]  ;;  %vm1923_vm1 = vcmask 1040384   ;;  %v2647_v4 = vand.u32 4294901760, %v2637_v1  ;;  %v2650_v5 = vand.u32 4294901760, %v2639_v2  ;;  %vm97_vm2 = vcmask 64512  }
  0x17   :  { %2242 = vmatprep.mubr.msk.f32.mxu0 %vm2568_vm0, %v2567_v0  ;;  %2272 = vmatprep.mubr.msk.f32.mxu1 %vm2568_vm0, %v2567_v0  ;;  %v2655_v6 = vld [vmem:[%s2962_s1 + $0x1] sm:$0x1]  ;;  %v1921_v7 = vmul.f32 %v2644_v3, %v2644_v3  ;;  %v2714_v19 = vand.u32 4294901760, %v2644_v3  ;;  %98 = vst.msk [vmem:[#allocation2] sm:$0xff] %vm97_vm2, %v2567_v0  ;;  %vm103_vm3 = vcmask 57344   ;;  %v2797_v30 = vshrl.u32 %v1893_v29, 7 }
  0x18   :  { %v1922_v8 = vmul.f32 %v2655_v6, %v2655_v6  ;;  %2241 = vmatpush3.xpose.msra.mxu0 %v2647_v4  ;;  %2271 = vmatpush3.xpose.msra.mxu1 %v2650_v5  ;;  %v2665_v9 = vsub.f32 %v2637_v1, %v2647_v4  ;;  %v2669_v10 = vsub.f32 %v2639_v2, %v2650_v5  ;;  %v2717_v20 = vand.u32 4294901760, %v2655_v6  ;;  %s2569_s25 = smov [#allocation11]  }
  0x19   :  { %v1924_v11 = vsel %vm1923_vm1, %v1921_v7, 0.0  ;;  %2245 = vmatprep.subr.mxu0 %v2567_v0  ;;  %2275 = vmatprep.subr.mxu1 %v2567_v0  ;;  %v1068_v21 = vsub.f32 %v2644_v3, %v2714_v19  ;;  %104 = vst.msk [vmem:[#allocation6] sm:$0x1] %vm103_vm3, %v2567_v0  ;;  %v2799_v31 = vand.u32 127, %v1893_v29  ;;  %vm99_vm5 = vcmask 0   ;;  %s2122_s26 = sshll.u32 %s2569_s25, 4  ;;  %s2123_s26 = int_to_ptr.vmem [resolvable:$true] %s2122_s26 }
  0x1a   :  { %v2675_v12 = vand.u32 4294901760, %v2665_v9  ;;  %v2678_v13 = vand.u32 4294901760, %v2669_v10  ;;  %1925 = vadd.xlane.f32.xlu0 %v1924_v11  ;;  %v1927_v14 = vsel %vm1923_vm1, %v1922_v8, 0.0  ;;  %v1514_v22 = vsub.f32 %v2655_v6, %v2717_v20  ;;  %100 = vst.msk [vmem:[#allocation3] sm:$0x1] %vm99_vm5, %v2567_v0  ;;  %s2446_s27 = scalar_lea.vmem %s2123_s26, 16  ;;  %p2451_p9 = scmp.lt.s32.totalorder %s2123_s26, %s2123_s26 }
  0x1b   :  { %v1069_v23 = vand.u32 4294901760, %v1068_v21  ;;  %vm1897_vm4 = vcmp.eq.s32.totalorder %v2797_v30, %v2799_v31  ;;  %101 = vst.msk [vmem:[#allocation4] sm:$0x1] %vm99_vm5, %v2567_v0  ;;  %102 = vst.msk [vmem:[#allocation5] sm:$0x1] %vm99_vm5, %v2567_v0  ;;  %p2447_p8 = scmp.ne.s32.totalorder %s2123_s26, %s2446_s27  ;;  %s2450_s28 = scalar_lea.vmem %s2123_s26, 32 }
  0x1c   :  { %v178_v15 = vsub.f32 %v2665_v9, %v2675_v12  ;;  %v624_v16 = vsub.f32 %v2669_v10, %v2678_v13  ;;  %v1515_v24 = vand.u32 4294901760, %v1514_v22  ;;  %p2452_p10 = scmp.lt.s32.totalorder %s2450_s28, %s2446_s27 }
  0x1d   :  { %v1070_v25 = vsub.f32 %v1068_v21, %v1069_v23 }
  0x1e   :  { %v179_v17 = vand.u32 4294901760, %v178_v15  ;;  %v625_v18 = vand.u32 4294901760, %v624_v16  ;;  %1928 = vadd.xlane.f32.xlu0 %v1927_v14  ;;  %v1516_v26 = vsub.f32 %v1514_v22, %v1515_v24  ;;  %v2825_v14 = vld [vmem:[%s2963_s2 + $0x1] sm:$0x1]  ;;  %p2453_p11 = por %p2452_p10, %p2451_p9 }
  0x1f   :  { %v1071_v27 = vand.u32 4294901760, %v1070_v25  ;;  %v2051_v16 = vsel %vm103_vm3, %v2825_v14, 0.0 }
  0x20   :  { %2243 = vmatmul.mubr.f32.vlgmr.msra.gmra.mrb[0].mxu0 %v179_v17  ;;  %2273 = vmatmul.mubr.f32.vlgmr.msra.gmra.mrb[0].mxu1 %v625_v18  ;;  %v1517_v28 = vand.u32 4294901760, %v1516_v26  ;;  %p2454_p12 = pnand %p2453_p11, %p2447_p8 }
  0x21   :  { %2246 = vmatpush3.xpose.msra.mxu0 %v179_v17  ;;  %2276 = vmatpush3.xpose.msra.mxu1 %v625_v18 }
  0x22   :  { %2247 = vmatprep.mubr.msk.f32.mxu0 %vm2568_vm0, %v2567_v0  ;;  %2250 = vmatprep.subr.mxu0 %v2567_v0 }
  0x23   :  { %2277 = vmatprep.mubr.msk.f32.mxu1 %vm2568_vm0, %v2567_v0  ;;  %2280 = vmatprep.subr.mxu1 %v2567_v0 }
  0x28   :  { %2248 = vmatmul.mubr.f32.vlgmr.msra.gmra.mrb[0].mxu0 %v2647_v4  ;;  %2278 = vmatmul.mubr.f32.vlgmr.msra.gmra.mrb[0].mxu1 %v2650_v5 }
  0x29   :  { %2251 = vmatpush3.xpose.msra.mxu0 %v2665_v9  ;;  %2281 = vmatpush3.xpose.msra.mxu1 %v2669_v10 }
  0x2a   :  { %2252 = vmatprep.mubr.msk.f32.mxu0 %vm2568_vm0, %v2567_v0  ;;  %2255 = vmatprep.subr.mxu0 %v2567_v0 }
  0x2b   :  { %2282 = vmatprep.mubr.msk.f32.mxu1 %vm2568_vm0, %v2567_v0  ;;  %2285 = vmatprep.subr.mxu1 %v2567_v0 }
  0x30   :  { %2253 = vmatmul.mubr.f32.vlgmr.msra.gmra.mrb[0].mxu0 %v2665_v9  ;;  %2283 = vmatmul.mubr.f32.vlgmr.msra.gmra.mrb[0].mxu1 %v2669_v10 }
  0x31   :  { %2256 = vmatpush3.xpose.msra.mxu0 %v2647_v4  ;;  %2286 = vmatpush3.xpose.msra.mxu1 %v2650_v5 }
  0x32   :  { %2257 = vmatprep.mubr.msk.f32.mxu0 %vm2568_vm0, %v2567_v0  ;;  %2260 = vmatprep.subr.mxu0 %v2567_v0 }
  0x33   :  { %2287 = vmatprep.mubr.msk.f32.mxu1 %vm2568_vm0, %v2567_v0  ;;  %2290 = vmatprep.subr.mxu1 %v2567_v0 }
  0x38   :  { %2258 = vmatmul.mubr.f32.vlgmr.msra.gmra.mrb[0].mxu0 %v2675_v12  ;;  %2288 = vmatmul.mubr.f32.vlgmr.msra.gmra.mrb[0].mxu1 %v2678_v13 }
  0x39   :  { %2261 = vmatpush3.xpose.msra.mxu0 %v2675_v12  ;;  %2291 = vmatpush3.xpose.msra.mxu1 %v2678_v13 }
  0x3a   :  { %2262 = vmatprep.mubr.msk.f32.mxu0 %vm2568_vm0, %v2567_v0  ;;  %2265 = vmatprep.subr.mxu0 %v2567_v0 }
  0x3b   :  { %2292 = vmatprep.mubr.msk.f32.mxu1 %vm2568_vm0, %v2567_v0  ;;  %2295 = vmatprep.subr.mxu1 %v2567_v0 }
  0x40   :  { %2263 = vmatmul.mubr.f32.vlgmr.msra.gmra.mrb[0].mxu0 %v2647_v4  ;;  %2293 = vmatmul.mubr.f32.vlgmr.msra.gmra.mrb[0].mxu1 %v2650_v5 }
  0x41   :  { %2266 = vmatpush3.xpose.msra.mxu0 %v2647_v4  ;;  %2296 = vmatpush3.xpose.msra.mxu1 %v2650_v5 }
  0x42   :  { %2267 = vmatprep.mubr.msk.f32.mxu0 %vm2568_vm0, %v2567_v0  ;;  %2297 = vmatprep.mubr.msk.f32.mxu1 %vm2568_vm0, %v2567_v0 }
  0x43   :  { %2300 = vmatprep.subr.mxu0 %v2567_v0  ;;  %2330 = vmatprep.subr.mxu1 %v2567_v0 }
  0x48   :  { %2268 = vmatmul.mubr.f32.vlgmr.msra.gmra.mrb[0].mxu0 %v2647_v4  ;;  %2298 = vmatmul.mubr.f32.vlgmr.msra.gmra.mrb[0].mxu1 %v2650_v5 }
  0x49   :  { %2301 = vmatpush3.xpose.msra.mxu0 %v2647_v4  ;;  %2331 = vmatpush3.xpose.msra.mxu1 %v2650_v5 }
  0x4a   :  { %2302 = vmatprep.mubr.msk.f32.mxu0 %vm2568_vm0, %v2567_v0  ;;  %2305 = vmatprep.subr.mxu0 %v2567_v0 }
  0x4b   :  { %2332 = vmatprep.mubr.msk.f32.mxu1 %vm2568_vm0, %v2567_v0  ;;  %2335 = vmatprep.subr.mxu1 %v2567_v0 }
  0x4c   :  { %2303 = vmatmul.mubr.f32.vlgmr.msra.gmra.mrb[2].mxu0 %v1071_v27  ;;  %2333 = vmatmul.mubr.f32.vlgmr.msra.gmra.mrb[2].mxu1 %v1517_v28 }
  0x4d   :  { %2306 = vmatpush3.xpose.msra.mxu0 %v179_v17  ;;  %2336 = vmatpush3.xpose.msra.mxu1 %v625_v18  ;;  %v2049_v18 = vld [vmem:[#allocation6] sm:$0x1] }
  0x4e   :  { %2307 = vmatprep.mubr.msk.f32.mxu0 %vm2568_vm0, %v2567_v0  ;;  %2310 = vmatprep.subr.mxu0 %v2567_v0 }
  0x4f   :  { %2337 = vmatprep.mubr.msk.f32.mxu1 %vm2568_vm0, %v2567_v0  ;;  %2340 = vmatprep.subr.mxu1 %v2567_v0 }
  0x54   :  { %2308 = vmatmul.mubr.f32.vlgmr.msra.gmra.mrb[2].mxu0 %v2714_v19  ;;  %2338 = vmatmul.mubr.f32.vlgmr.msra.gmra.mrb[2].mxu1 %v2717_v20 }
  0x55   :  { %2311 = vmatpush3.xpose.msra.mxu0 %v2665_v9  ;;  %2341 = vmatpush3.xpose.msra.mxu1 %v2669_v10 }
  0x56   :  { %2312 = vmatprep.mubr.msk.f32.mxu0 %vm2568_vm0, %v2567_v0  ;;  %2315 = vmatprep.subr.mxu0 %v2567_v0 }
  0x57   :  { %2342 = vmatprep.mubr.msk.f32.mxu1 %vm2568_vm0, %v2567_v0  ;;  %2345 = vmatprep.subr.mxu1 %v2567_v0 }
  0x5c   :  { %2313 = vmatmul.mubr.f32.vlgmr.msra.gmra.mrb[2].mxu0 %v1068_v21  ;;  %2343 = vmatmul.mubr.f32.vlgmr.msra.gmra.mrb[2].mxu1 %v1514_v22 }
  0x5d   :  { %2316 = vmatpush3.xpose.msra.mxu0 %v2647_v4  ;;  %2346 = vmatpush3.xpose.msra.mxu1 %v2650_v5 }
  0x5e   :  { %2317 = vmatprep.mubr.msk.f32.mxu0 %vm2568_vm0, %v2567_v0  ;;  %2320 = vmatprep.subr.mxu0 %v2567_v0 }
  0x5f   :  { %2347 = vmatprep.mubr.msk.f32.mxu1 %vm2568_vm0, %v2567_v0  ;;  %2350 = vmatprep.subr.mxu1 %v2567_v0 }
  0x64   :  { %2318 = vmatmul.mubr.f32.vlgmr.msra.gmra.mrb[2].mxu0 %v1069_v23  ;;  %2348 = vmatmul.mubr.f32.vlgmr.msra.gmra.mrb[2].mxu1 %v1515_v24 }
  0x65   :  { %2321 = vmatpush3.xpose.msra.mxu0 %v2675_v12  ;;  %2351 = vmatpush3.xpose.msra.mxu1 %v2678_v13  ;;  %v2820_v13 = vld [vmem:[%s2963_s2] sm:$0x1] }
  0x66   :  { %2322 = vmatprep.mubr.msk.f32.mxu0 %vm2568_vm0, %v2567_v0  ;;  %2325 = vmatprep.subr.mxu0 %v2567_v0  ;;  %v2050_v15 = vsel %vm103_vm3, %v2820_v13, 0.0 }
  0x67   :  { %2352 = vmatprep.mubr.msk.f32.mxu1 %vm2568_vm0, %v2567_v0  ;;  %2355 = vmatprep.subr.mxu1 %v2567_v0  ;;  %v2052_v17 = vadd.f32 %v2051_v16, %v2050_v15 }
  0x6c   :  { %2323 = vmatmul.mubr.f32.vlgmr.msra.gmra.mrb[2].mxu0 %v2714_v19  ;;  %2353 = vmatmul.mubr.f32.vlgmr.msra.gmra.mrb[2].mxu1 %v2717_v20 }
  0x6d   :  { %2326 = vmatpush3.xpose.msra.mxu0 %v2647_v4  ;;  %2356 = vmatpush3.xpose.msra.mxu1 %v2650_v5 }
  0x6e   :  { %2327 = vmatprep.mubr.msk.f32.mxu0 %vm2568_vm0, %v2567_v0  ;;  %2357 = vmatprep.mubr.msk.f32.mxu1 %vm2568_vm0, %v2567_v0 }
  0x74   :  { %2328 = vmatmul.mubr.f32.vlgmr.msra.gmra.mrb[2].mxu0 %v2714_v19  ;;  %2358 = vmatmul.mubr.f32.vlgmr.msra.gmra.mrb[2].mxu1 %v2717_v20  ;;  %v2053_v19 = vadd.f32 %v2052_v17, %v2049_v18  ;;  %v2061_v17 = vrot.slane %v2639_v2, 4 }
  0x76   :  { %2054 = vst.msk [vmem:[#allocation6] sm:$0x1] %vm103_vm3, %v2053_v19 }
  0xa7   :  { %v1926_v48 = vpop.xlane.xlu0 %1925 }
  0xab   :  { %v1929_v53 = vpop.xlane.xlu0 %1928 }
 0x11b   :  { %v2803_v32 = vpop.f32.mrb[0].mxu0  ;;  %v2805_v33 = vpop.f32.mrb[0].mxu1 }
 0x11c   :  { %v1900_v34 = vsel %vm1897_vm4, %v2803_v32, 0.0  ;;  %v2269_v35 = vpop.f32.mrb[1].mxu0  ;;  %v2299_v36 = vpop.f32.mrb[1].mxu1  ;;  %v1901_v38 = vsel %vm1897_vm4, %v2805_v33, 0.0  ;;  %v1932_v26 = vmul.f32 2.0, %v2803_v32 }
 0x11d   :  { %v1903_v37 = vsel %vm97_vm2, %v1900_v34, 0.0  ;;  %v1906_v39 = vsel %vm97_vm2, %v1901_v38, 0.0  ;;  %v1933_v34 = vmul.f32 2.0, %v2805_v33 }
 0x11e   :  { %1904 = vadd.xlane.f32.xlu1 %v1903_v37  ;;  %v1909_v40 = vrot.slane %v1903_v37, 4  ;;  %v1915_v41 = vrot.slane %v1906_v39, 4 }
 0x120   :  { %v1910_v42 = vadd.f32 %v1909_v40, %v1903_v37  ;;  %v1916_v43 = vadd.f32 %v1915_v41, %v1906_v39 }
 0x122   :  { %1907 = vadd.xlane.f32.xlu1 %v1906_v39  ;;  %v1911_v44 = vrot.slane %v1910_v42, 2  ;;  %v1917_v45 = vrot.slane %v1916_v43, 2 }
 0x124   :  { %v1912_v46 = vadd.f32 %v1911_v44, %v1910_v42  ;;  %v1918_v47 = vadd.f32 %v1917_v45, %v1916_v43  ;;  %v2055_v43 = vrot.slane %v2637_v1, 4 }
 0x126   :  { %v1913_v49 = vrot.slane %v1912_v46, 1  ;;  %v1919_v50 = vrot.slane %v1918_v47, 1  ;;  %v2056_v32 = vadd.f32 %v2055_v43, %v2637_v1 }
 0x128   :  { %v1914_v51 = vadd.f32 %v1913_v49, %v1912_v46  ;;  %v1920_v52 = vadd.f32 %v1919_v50, %v1918_v47  ;;  %v2057_v45 = vrot.slane %v2056_v32, 2 }
 0x12a   :  { %v1948_v56 = vadd.f32 %v1926_v48, %v1914_v51  ;;  %v1949_v57 = vadd.f32 %v1929_v53, %v1920_v52  ;;  %v2058_v47 = vadd.f32 %v2057_v45, %v2056_v32 }
 0x12c   :  { %v2059_v53 = vrot.slane %v2058_v47, 1 }
 0x147   :  { %v1443_v54 = vpop.f32.mrb[2].mxu0  ;;  %v1889_v55 = vpop.f32.mrb[2].mxu1 }
 0x148   :  { %v1950_v58 = vmul.f32 2.0, %v1443_v54  ;;  %v1951_v59 = vmul.f32 2.0, %v1889_v55  ;;  %v2329_v60 = vpop.f32.mrb[3].mxu0  ;;  %v2359_v61 = vpop.f32.mrb[3].mxu1  ;;  %v1964_v54 = vld [vmem:[#allocation2] sm:$0xff] }
 0x149   :  { %v2060_v61 = vadd.f32 %v2059_v53, %v2058_v47 }
 0x14a   :  { %v1952_v62 = vsub.f32 %v1948_v56, %v1950_v58  ;;  %v1953_v63 = vsub.f32 %v1949_v57, %v1951_v59 }
 0x14b   :  { %v2068_v30 = vmul.f32 0.125, %v2060_v61 }
 0x14c   :  { %v1954_v4 = vmax.f32 %v1952_v62, 0.0  ;;  %v1955_v5 = vmax.f32 %v1953_v63, 0.0 }
 0x14e   :  { %v1956_v7 = vsub.f32 0.0, %v1954_v4  ;;  %v1957_v8 = vsub.f32 0.0, %v1955_v5 }
 0x150   :  { %v1958_v9 = vmul.f32 0.0078125, %v1956_v7  ;;  %v1959_v10 = vmul.f32 0.0078125, %v1957_v8 }
 0x152   :  { %v1960_v11 = vmul.f32 1.442695, %v1958_v9  ;;  %v1962_v12 = vmul.f32 1.442695, %v1959_v10  ;;  %v2070_v9 = vsub.f32 %v2068_v30, %v2644_v3 }
 0x154   :  { %2416 = vpow2.f32 %v1960_v11  ;;  %v2072_v16 = vmul.f32 %v2070_v9, %v2070_v9 }
 0x155   :  { %2418 = vpow2.f32 %v1962_v12 }
 0x156   :  { %v2074_v19 = vsel %vm1923_vm1, %v2072_v16, 0.0 }
 0x15e   :  { %v2832_v20 = vpop.eup %2416 }
 0x15f   :  { %v2834_v21 = vpop.eup %2418  ;;  %v1972_v22 = vsel %vm103_vm3, %v2832_v20, 0.0 }
 0x160   :  { %v1973_v23 = vsel %vm103_vm3, %v2834_v21, 0.0  ;;  %2021 = vadd.xlane.f32.xlu0 %v1972_v22 }
 0x161   :  { %2023 = vadd.xlane.f32.xlu1 %v1973_v23  ;;  %v1974_v24 = vadd.f32 %v1973_v23, %v1972_v22  ;;  %v2062_v22 = vadd.f32 %v2061_v17, %v2639_v2 }
 0x163   :  { %v2063_v3 = vrot.slane %v2062_v22, 2 }
 0x164   :  { %1975 = vadd.xlane.f32.xlu0 %v1974_v24 }
 0x165   :  { %v2064_v23 = vadd.f32 %v2063_v3, %v2062_v22 }
 0x167   :  { %v2065_v24 = vrot.slane %v2064_v23, 1 }
 0x1ab   :  { %v1905_v25 = vpop.xlane.xlu1 %1904 }
 0x1ac   :  { %v1930_v27 = vadd.f32 %v1914_v51, %v1905_v25  ;;  %v2066_v25 = vadd.f32 %v2065_v24, %v2064_v23 }
 0x1ae   :  { %v1934_v28 = vsub.f32 %v1930_v27, %v1932_v26 }
 0x1af   :  { %v1908_v29 = vpop.xlane.xlu1 %1907 }
 0x1b0   :  { %v1936_v35 = vmax.f32 %v1934_v28, 0.0  ;;  %v1931_v36 = vadd.f32 %v1920_v52, %v1908_v29 }
 0x1b2   :  { %v1938_v37 = vsub.f32 0.0, %v1936_v35  ;;  %v1935_v38 = vsub.f32 %v1931_v36, %v1933_v34  ;;  %v2069_v34 = vmul.f32 0.125, %v2066_v25 }
 0x1b4   :  { %v1940_v39 = vmul.f32 0.0078125, %v1938_v37  ;;  %v1937_v40 = vmax.f32 %v1935_v38, 0.0 }
 0x1b6   :  { %v1942_v41 = vmul.f32 1.442695, %v1940_v39  ;;  %v1939_v42 = vsub.f32 0.0, %v1937_v40  ;;  %v2071_v40 = vsub.f32 %v2069_v34, %v2655_v6  ;;  %v1970_v6 = vld [vmem:[#allocation3] sm:$0x1] }
 0x1b8   :  { %2420 = vpow2.f32 %v1942_v41  ;;  %v1941_v0 = vmul.f32 0.0078125, %v1939_v42  ;;  %v2073_v45 = vmul.f32 %v2071_v40, %v2071_v40 }
 0x1ba   :  { %v1944_v44 = vmul.f32 1.442695, %v1941_v0  ;;  %v2077_v47 = vsel %vm1923_vm1, %v2073_v45, 0.0 }
 0x1bc   :  { %2422 = vpow2.f32 %v1944_v44 }
 0x1c2   :  { %v2421_v46 = vpop.eup %2420 }
 0x1c3   :  { %v1946_v33 = vsel %vm1897_vm4, 0.0, %v2421_v46 }
 0x1c4   :  { %v1965_v48 = vsel %vm97_vm2, %v1946_v33, 0.0 }
 0x1c5   :  { %v1990_v49 = vrot.slane %v1965_v48, 4 }
 0x1c6   :  { %v2423_v50 = vpop.eup %2422 }
 0x1c7   :  { %v1947_v51 = vsel %vm1897_vm4, 0.0, %v2423_v50  ;;  %v1991_v52 = vadd.f32 %v1990_v49, %v1965_v48 }
 0x1c8   :  { %v1966_v1 = vsel %vm97_vm2, %v1947_v51, 0.0 }
 0x1c9   :  { %v1992_v55 = vrot.slane %v1991_v52, 2  ;;  %v1996_v56 = vrot.slane %v1966_v1, 4  ;;  %v1967_v57 = vadd.f32 %v1966_v1, %v1965_v48 }
 0x1cb   :  { %v1993_v58 = vadd.f32 %v1992_v55, %v1991_v52  ;;  %v1997_v59 = vadd.f32 %v1996_v56, %v1966_v1  ;;  %v1968_v60 = vadd.f32 %v1967_v57, %v1964_v54 }
 0x1cd   :  { %v1994_v62 = vrot.slane %v1993_v58, 1  ;;  %v1998_v63 = vrot.slane %v1997_v59, 2  ;;  %1969 = vst.msk [vmem:[#allocation2] sm:$0xff] %vm97_vm2, %v1968_v60 }
 0x1cf   :  { %v1995_v4 = vadd.f32 %v1994_v62, %v1993_v58  ;;  %v1999_v5 = vadd.f32 %v1998_v63, %v1997_v59 }
 0x1d1   :  { %v2000_v31 = vrot.slane %v1999_v5, 1  ;;  %v2003_v8 = vmul.f32 %v1995_v4, %v2820_v13 }
 0x1d3   :  { %v2001_v7 = vadd.f32 %v2000_v31, %v1999_v5  ;;  %v2005_v12 = vsel %vm103_vm3, %v2003_v8, 0.0 }
 0x1d4   :  { %v2087_v10 = vld [vmem:[#allocation2] sm:$0xff] }
 0x1d5   :  { %v2004_v11 = vmul.f32 %v2001_v7, %v2825_v14  ;;  %2088 = vst.msk [vmem:[#allocation10] sm:$0xff] %vm97_vm2, %v2087_v10 }
 0x1d7   :  { %v2006_v15 = vsel %vm103_vm3, %v2004_v11, 0.0 }
 0x1d8   :  { %v2007_v18 = vadd.f32 %v2006_v15, %v2005_v12 }
 0x1da   :  { %2008 = vadd.xlane.f32.xlu1 %v2007_v18 }
 0x1de   :  { %2075 = vadd.xlane.f32.xlu1 %v2074_v19 }
 0x1ed   :  { %v2022_v26 = vpop.xlane.xlu0 %2021 }
 0x1ee   :  { %v2024_v27 = vpop.xlane.xlu1 %2023  ;;  %v2025_v28 = vsub.f32 %v2022_v26, %v2832_v20 }
 0x1ef   :  { %v2026_v29 = vsub.f32 %v2024_v27, %v2834_v21 }
 0x1f0   :  { %v2027_v35 = vmul.f32 0.14285715, %v2025_v28 }
 0x1f1   :  { %v2028_v36 = vmul.f32 0.14285715, %v2026_v29  ;;  %v1976_v37 = vpop.xlane.xlu0 %1975 }
 0x1f2   :  { %v2030_v38 = vsub.f32 %v2832_v20, %v2027_v35  ;;  %v1977_v39 = vrot.slane %v1976_v37, 4 }
 0x1f3   :  { %v2031_v2 = vsub.f32 %v2834_v21, %v2028_v36 }
 0x1f4   :  { %v1978_v41 = vadd.f32 %v1977_v39, %v1976_v37  ;;  %v2032_v42 = vmul.f32 %v2030_v38, %v2820_v13 }
 0x1f5   :  { %v2033_v43 = vmul.f32 %v2031_v2, %v2825_v14 }
 0x1f6   :  { %v1979_v0 = vrot.slane %v1978_v41, 2  ;;  %v2034_v44 = vsel %vm103_vm3, %v2032_v42, 0.0 }
 0x1f7   :  { %v2035_v32 = vsel %vm103_vm3, %v2033_v43, 0.0 }
 0x1f8   :  { %v2036_v46 = vadd.f32 %v2035_v32, %v2034_v44  ;;  %v1980_v33 = vadd.f32 %v1979_v0, %v1978_v41 }
 0x1fa   :  { %2037 = vadd.xlane.f32.xlu0 %v2036_v46  ;;  %v1981_v20 = vrot.slane %v1980_v33, 1 }
 0x1fc   :  { %v1982_v21 = vadd.f32 %v1981_v20, %v1980_v33 }
 0x1fe   :  { %2400 = vpush %v1982_v21  ;;  %2078 = vadd.xlane.f32.xlu0 %v2077_v47 }
 0x22f   :  { %s2401_s2 = spop %2400 }
 0x230   :  { %v1984_v13 = vstv %s2401_s2 }
 0x231   :  { %v1985_v48 = vadd.f32 %v1984_v13, %v1970_v6 }
 0x233   :  { %1987 = vst.msk [vmem:[#allocation3] sm:$0x1] %vm99_vm5, %v1985_v48 }
 0x23a   :  { %v2089_v14 = vld [vmem:[#allocation3] sm:$0x1] }
 0x23b   :  { %2090 = vst.msk [vmem:[#allocation11] sm:$0x1] %vm99_vm5, %v2089_v14 }
 0x23c   :  { %2457 = shalt.err (!%p2454_p12)
}
 0x23d   :  { %s2458_s9 = scalar_lea.hbm %s2966_s5, 16 }
 0x23e   :  { %p2459_p13 = scmp.ne.s32.totalorder %s2966_s5, %s2458_s9  ;;  %p2462_p0 = scmp.lt.u32.totalorder %s2458_s9, %s2966_s5 }
 0x240   :  { %p2464_p1 = pnand %p2462_p0, %p2459_p13 }
 0x242   :  { %2467 = shalt.err (!%p2464_p1)
}
 0x243   :  { %2125 = dma.vmem_to_hbm [thread:$0]  %s2123_s26, 16, %s2966_s5, [#allocation12]   ;;  %v2095_v49 = vld [vmem:[#allocation6] sm:$0x1] }
 0x244   :  { %s2570_s16 = smov [#allocation10]   ;;  %2096 = vst.msk [vmem:[#allocation16] sm:$0x1] %vm103_vm3, %v2095_v49 }
 0x245   :  { %s2112_s17 = sshll.u32 %s2570_s16, 4  ;;  %s2113_s17 = int_to_ptr.vmem [resolvable:$true] %s2112_s17 }
 0x246   :  { %s2468_s18 = scalar_lea.vmem %s2113_s17, 128  ;;  %p2473_p3 = scmp.lt.s32.totalorder %s2113_s17, %s2113_s17 }
 0x247   :  { %p2469_p2 = scmp.ne.s32.totalorder %s2113_s17, %s2468_s18  ;;  %p2474_p4 = scmp.lt.s32.totalorder %s2468_s18, %s2468_s18 }
 0x249   :  { %p2475_p5 = por %p2474_p4, %p2473_p3 }
 0x24b   :  { %p2476_p6 = pnand %p2475_p5, %p2469_p2 }
 0x24d   :  { %2479 = shalt.err (!%p2476_p6)
}
 0x24e   :  { %s2480_s20 = scalar_lea.hbm %s2965_s4, 128 }
 0x24f   :  { %p2481_p7 = scmp.ne.s32.totalorder %s2965_s4, %s2480_s20  ;;  %p2484_p8 = scmp.lt.u32.totalorder %s2480_s20, %s2965_s4 }
 0x251   :  { %p2486_p9 = pnand %p2484_p8, %p2481_p7 }
 0x253   :  { %2489 = shalt.err (!%p2486_p9)
}
 0x254   :  { %2115 = dma.vmem_to_hbm [thread:$0]  %s2113_s17, 128, %s2965_s4, [#allocation9]   ;;  %v2002_v31 = vld [vmem:[#allocation4] sm:$0x1] }
 0x255   :  { %s2571_s29 = smov [#allocation13]  }
 0x256   :  { %s2132_s30 = sshll.u32 %s2571_s29, 4  ;;  %s2133_s30 = int_to_ptr.vmem [resolvable:$true] %s2132_s30 }
 0x257   :  { %s2490_s9 = scalar_lea.vmem %s2133_s30, 16  ;;  %s2494_s10 = scalar_lea.vmem %s2133_s30, 32 }
 0x258   :  { %p2491_p10 = scmp.ne.s32.totalorder %s2133_s30, %s2490_s9  ;;  %p2495_p11 = scmp.lt.s32.totalorder %s2133_s30, %s2133_s30 }
 0x259   :  { %p2496_p12 = scmp.lt.s32.totalorder %s2494_s10, %s2490_s9 }
 0x25b   :  { %p2497_p13 = por %p2496_p12, %p2495_p11 }
 0x25d   :  { %p2498_p0 = pnand %p2497_p13, %p2491_p10 }
 0x267   :  { %v2009_v50 = vpop.xlane.xlu1 %2008 }
 0x268   :  { %v2010_v51 = vrot.slane %v2009_v50, 4 }
 0x26a   :  { %v2011_v52 = vadd.f32 %v2010_v51, %v2009_v50 }
 0x26b   :  { %v2076_v53 = vpop.xlane.xlu1 %2075 }
 0x26c   :  { %v2012_v1 = vrot.slane %v2011_v52, 2  ;;  %v2080_v54 = vmul.f32 0.015625, %v2076_v53 }
 0x26e   :  { %v2013_v55 = vadd.f32 %v2012_v1, %v2011_v52  ;;  %2082 = vst.msk [vmem:[%s2964_s3] sm:$0x1] %vm99_vm5, %v2080_v54 }
 0x270   :  { %v2014_v56 = vrot.slane %v2013_v55, 1 }
 0x272   :  { %v2015_v57 = vadd.f32 %v2014_v56, %v2013_v55 }
 0x274   :  { %2402 = vpush %v2015_v57 }
 0x287   :  { %v2038_v58 = vpop.xlane.xlu0 %2037 }
 0x288   :  { %v2039_v59 = vrot.slane %v2038_v58, 4 }
 0x28a   :  { %v2040_v60 = vadd.f32 %v2039_v59, %v2038_v58 }
 0x28b   :  { %v2079_v61 = vpop.xlane.xlu0 %2078 }
 0x28c   :  { %v2041_v62 = vrot.slane %v2040_v60, 2  ;;  %v2081_v63 = vmul.f32 0.015625, %v2079_v61 }
 0x28e   :  { %v2042_v4 = vadd.f32 %v2041_v62, %v2040_v60  ;;  %2083 = vst.msk [vmem:[%s2964_s3 + $0x1] sm:$0x1] %vm99_vm5, %v2081_v63 }
 0x290   :  { %v2043_v5 = vrot.slane %v2042_v4, 1 }
 0x292   :  { %v2044_v30 = vadd.f32 %v2043_v5, %v2042_v4 }
 0x294   :  { %2404 = vpush %v2044_v30 }
 0x2a5   :  { %s2403_s27 = spop %2402 }
 0x2a6   :  { %s2017_s28 = smul.f32 2.0, %s2403_s27 }
 0x2a8   :  { %v2018_v7 = vstv %s2017_s28 }
 0x2a9   :  { %v2019_v8 = vadd.f32 %v2018_v7, %v2002_v31 }
 0x2ab   :  { %2020 = vst.msk [vmem:[#allocation4] sm:$0x1] %vm99_vm5, %v2019_v8 }
 0x2b2   :  { %v2091_v9 = vld [vmem:[#allocation4] sm:$0x1] }
 0x2b3   :  { %2092 = vst.msk [vmem:[#allocation13] sm:$0x1] %vm99_vm5, %v2091_v9 }
 0x2b4   :  { %2501 = shalt.err (!%p2498_p0)
}
 0x2b5   :  { %s2502_s12 = scalar_lea.hbm %s2967_s6, 16 }
 0x2b6   :  { %p2503_p1 = scmp.ne.s32.totalorder %s2967_s6, %s2502_s12  ;;  %p2506_p2 = scmp.lt.u32.totalorder %s2502_s12, %s2967_s6 }
 0x2b8   :  { %p2508_p3 = pnand %p2506_p2, %p2503_p1 }
 0x2ba   :  { %2511 = shalt.err (!%p2508_p3)
}
 0x2bb   :  { %2135 = dma.vmem_to_hbm [thread:$0]  %s2133_s30, 16, %s2967_s6, [#allocation12]   ;;  %v2029_v10 = vld [vmem:[#allocation5] sm:$0x1] }
 0x2bc   :  { %s2572_s0 = smov [#allocation14]   ;;  %s2573_s21 = smov [#allocation16]  }
 0x2bd   :  { %s2142_s20 = sshll.u32 %s2572_s0, 4  ;;  %s2152_s1 = sshll.u32 %s2573_s21, 4  ;;  %s2143_s20 = int_to_ptr.vmem [resolvable:$true] %s2142_s20  ;;  %s2928_s1 = int_to_ptr.vmem [resolvable:$true] %s2152_s1 }
 0x2be   :  { %s2512_s5 = scalar_lea.vmem %s2143_s20, 16  ;;  %s2516_s22 = scalar_lea.vmem %s2143_s20, 32 }
 0x2bf   :  { %p2513_p4 = scmp.ne.s32.totalorder %s2143_s20, %s2512_s5  ;;  %p2517_p5 = scmp.lt.s32.totalorder %s2143_s20, %s2143_s20 }
 0x2c0   :  { %p2518_p6 = scmp.lt.s32.totalorder %s2516_s22, %s2512_s5 }
 0x2c2   :  { %p2519_p7 = por %p2518_p6, %p2517_p5 }
 0x2c4   :  { %p2520_p8 = pnand %p2519_p7, %p2513_p4 }
 0x2c5   :  { %s2405_s19 = spop %2404 }
 0x2c6   :  { %v2046_v11 = vstv %s2405_s19 }
 0x2c7   :  { %v2047_v12 = vadd.f32 %v2046_v11, %v2029_v10 }
 0x2c9   :  { %2048 = vst.msk [vmem:[#allocation5] sm:$0x1] %vm99_vm5, %v2047_v12 }
 0x2d0   :  { %v2093_v15 = vld [vmem:[#allocation5] sm:$0x1] }
 0x2d1   :  { %2094 = vst.msk [vmem:[#allocation14] sm:$0x1] %vm99_vm5, %v2093_v15 }
 0x2d2   :  { %2523 = shalt.err (!%p2520_p8)
}
 0x2d3   :  { %s2524_s24 = scalar_lea.hbm %s2968_s7, 16 }
 0x2d4   :  { %p2525_p9 = scmp.ne.s32.totalorder %s2968_s7, %s2524_s24  ;;  %p2528_p10 = scmp.lt.u32.totalorder %s2524_s24, %s2968_s7 }
 0x2d6   :  { %p2530_p11 = pnand %p2528_p10, %p2525_p9 }
 0x2d8   :  { %2533 = shalt.err (!%p2530_p11)
}
 0x2d9   :  { %2145 = dma.vmem_to_hbm [thread:$0]  %s2143_s20, 16, %s2968_s7, [#allocation15]  }
 0x2da   :  { %s2534_s29 = scalar_lea.vmem %s2928_s1, 16  ;;  %s2538_s30 = scalar_lea.vmem %s2928_s1, 32 }
 0x2db   :  { %p2535_p12 = scmp.ne.s32.totalorder %s2928_s1, %s2534_s29  ;;  %p2539_p13 = scmp.lt.s32.totalorder %s2928_s1, %s2928_s1 }
 0x2dc   :  { %p2540_p0 = scmp.lt.s32.totalorder %s2538_s30, %s2534_s29 }
 0x2de   :  { %p2541_p1 = por %p2540_p0, %p2539_p13 }
 0x2e0   :  { %p2542_p2 = pnand %p2541_p1, %p2535_p12 }
 0x2e2   :  { %2545 = shalt.err (!%p2542_p2)
}
 0x2e3   :  { %s2546_s3 = scalar_lea.hbm %s2969_s8, 16 }
 0x2e4   :  { %p2547_p3 = scmp.ne.s32.totalorder %s2969_s8, %s2546_s3  ;;  %p2550_p4 = scmp.lt.u32.totalorder %s2546_s3, %s2969_s8 }
 0x2e6   :  { %p2552_p5 = pnand %p2550_p4, %p2547_p3 }
 0x2e8   :  { %2555 = shalt.err (!%p2552_p5)
}
 0x2e9   :  { %2155 = dma.vmem_to_hbm [thread:$0]  %s2928_s1, 16, %s2969_s8, [#allocation15]  }
 0x2ea   :  { %2558 = dma.done.wait [#allocation9], 128  }
 0x2eb   :  { %2559 = vsyncadd [#allocation9], 4294967168 }
 0x2ec   :  { %2560 = dma.done.wait [#allocation12], 32  }
 0x2ed   :  { %2561 = vsyncadd [#allocation12], 4294967264 }
 0x2ee   :  { %2562 = dma.done.wait [#allocation15], 32  }
 0x2ef   :  { %2563 = vsyncadd [#allocation15], 4294967264 }
 0x2f0   :  { %2178 = vsyncpa [#allocation8], 1 }
 0x2f1   :  { %2179 = vsyncpa [#allocation9], 1 }
 0x2f2   :  { %2180 = vsyncpa [#allocation12], 1 }
 0x2f3   :  { %2181 = vsyncpa [#allocation15], 1 }

</bundles_post_ra>
